<compile_context>
chip_gen: v7x
topology: tpu7x:2x2x1
jax: 0.10.0
libtpu: 0.0.40
codegen_flags: <defaults>
</compile_context>

<pallas_src>
import jax
import jax.numpy as jnp
from jax.experimental import pallas as pl
from jax.experimental.pallas import tpu as pltpu

_LANE = 128      # vreg lane width
_SUBLANE = 8     # f32 sublane packing


def _drop_path_rows_kernel(scale_ref, x_ref, o_ref):
    # scale_ref: SMEM (B,) f32 per-sample scaled keep mask {0, 1/keep_prob}
    # x_ref / o_ref: (1, TILE_R, 128) tile of one sample's features
    b = pl.program_id(0)
    o_ref[...] = (x_ref[...] * scale_ref[b]).astype(o_ref.dtype)


def _drop_path_flat_kernel(scale_ref, x_ref, o_ref):
    # Fallback: scale_ref (B, 1) f32 in VMEM (resident), x_ref/o_ref (B, TILE)
    o_ref[...] = (x_ref[...] * scale_ref[...]).astype(o_ref.dtype)


def _vmem_capacity_bytes() -> int:
    try:
        cap = getattr(pltpu.get_tpu_info(), "vmem_capacity_bytes", None)
        if cap:
            return int(cap)
    except Exception:
        pass
    return 64 * 1024 * 1024  # conservative default (v7x physical VMEM)


def drop_path(x, drop_prob, key, *, training=True):
    """Pallas DropPath: out = x / keep_prob * floor(keep_prob + U[0,1)) per sample.

    Identity when drop_prob == 0.0 or not training (matches the nn.Module).
    """
    if drop_prob == 0.0 or not training:
        return x

    keep_prob = 1.0 - float(drop_prob)
    orig_shape = x.shape
    B = orig_shape[0]
    F = 1
    for d in orig_shape[1:]:
        F *= int(d)
    itemsize = jnp.dtype(x.dtype).itemsize

    # Per-sample keep mask in float32 (accurate drop rate even for bf16 inputs),
    # pre-scaled by 1/keep_prob so the kernel does a single broadcast multiply.
    u = jax.random.uniform(key, (B,), dtype=jnp.float32)
    scale = jnp.floor(keep_prob + u) * (1.0 / keep_prob)  # (B,) f32

    # Generation-aware block sizing: v7x has 64 MiB VMEM, v5e/v6e have 128 MiB.
    vmem_cap = _vmem_capacity_bytes()
    vmem_limit = min(vmem_cap * 3 // 4, 96 * 1024 * 1024)  # scoped limit we request
    block_target = vmem_limit // 6                          # 4 pipeline buffers + headroom

    cost = pl.CostEstimate(
        flops=B * F,
        transcendentals=0,
        bytes_accessed=2 * B * F * itemsize,
    )

    if F % _LANE == 0:
        # Fast path: fully packed sublanes/lanes independent of batch size.
        R = F // _LANE
        rows_per_block = max(
            _SUBLANE, (block_target // (_LANE * itemsize)) // _SUBLANE * _SUBLANE
        )
        tile_r = R if R <= rows_per_block else rows_per_block

        xr = x.reshape(B, R, _LANE)  # free contiguous reshape
        out = pl.pallas_call(
            _drop_path_rows_kernel,
            out_shape=jax.ShapeDtypeStruct((B, R, _LANE), x.dtype),
            grid=(B, pl.cdiv(R, tile_r)),
            in_specs=[
                pl.BlockSpec(memory_space=pltpu.MemorySpace.SMEM),  # (B,) scale
                pl.BlockSpec((1, tile_r, _LANE), lambda b, r: (b, r, 0)),
            ],
            out_specs=pl.BlockSpec((1, tile_r, _LANE), lambda b, r: (b, r, 0)),
            compiler_params=pltpu.CompilerParams(
                dimension_semantics=("parallel", "parallel"),
                vmem_limit_bytes=vmem_limit,
            ),
            cost_estimate=cost,
        )(scale, xr)
        return out.reshape(orig_shape)

    # Fallback: F not a multiple of 128. Keep (B, F); lane axis tiled, Pallas
    # masks the partial boundary block (no pad/slice extra pass over HBM).
    xf = x.reshape(B, F)
    tile = max(_LANE, (block_target // max(B * itemsize, 1)) // _LANE * _LANE)
    tile = min(tile, pl.cdiv(F, _LANE) * _LANE)
    out = pl.pallas_call(
        _drop_path_flat_kernel,
        out_shape=jax.ShapeDtypeStruct((B, F), x.dtype),
        grid=(pl.cdiv(F, tile),),
        in_specs=[
            pl.BlockSpec((B, 1), lambda j: (0, 0)),      # scale, resident across grid
            pl.BlockSpec((B, tile), lambda j: (0, j)),   # x marches over features
        ],
        out_specs=pl.BlockSpec((B, tile), lambda j: (0, j)),
        compiler_params=pltpu.CompilerParams(
            dimension_semantics=("parallel",),
            vmem_limit_bytes=vmem_limit,
        ),
        cost_estimate=cost,
    )(scale.reshape(B, 1), xf)
    return out.reshape(orig_shape)


if __name__ == "__main__":
    key = jax.random.PRNGKey(0)
    k_x, k_mask, k_x2, k_mask2 = jax.random.split(key, 4)

    drop_prob = 0.25
    keep_prob = 1.0 - drop_prob

    # --- Fast path: NCHW input with features divisible by 128 -------------
    B, C, H, W = 2, 4, 16, 16
    x = jax.random.normal(k_x, (B, C, H, W), dtype=jnp.float32)

    out = drop_path(x, drop_prob, k_mask, training=True)
    out = jax.block_until_ready(out)

    u = jax.random.uniform(k_mask, (B,), dtype=jnp.float32)
    mask = jnp.floor(keep_prob + u).astype(x.dtype).reshape(B, 1, 1, 1)
    ref = x / keep_prob * mask
    assert out.shape == x.shape and out.dtype == x.dtype
    assert jnp.allclose(out, ref, atol=1e-6, rtol=1e-5)

    # --- Fallback path: feature count not a multiple of 128 ----------------
    B2 = 2
    x2 = jax.random.normal(k_x2, (B2, 3, 7, 9), dtype=jnp.float32)
    out2 = jax.block_until_ready(drop_path(x2, drop_prob, k_mask2, training=True))
    u2 = jax.random.uniform(k_mask2, (B2,), dtype=jnp.float32)
    mask2 = jnp.floor(keep_prob + u2).astype(x2.dtype).reshape(B2, 1, 1, 1)
    ref2 = x2 / keep_prob * mask2
    assert out2.shape == x2.shape and out2.dtype == x2.dtype
    assert jnp.allclose(out2, ref2, atol=1e-6, rtol=1e-5)

    # --- Eval / zero-prob paths must be exact identity (no kernel launch) --
    assert jnp.array_equal(drop_path(x, drop_prob, k_mask, training=False), x)
    assert jnp.array_equal(drop_path(x, 0.0, k_mask, training=True), x)

    print("KERNEL_OK")
</pallas_src>

<mosaic_0001>
module attributes {stable_mosaic.version = 11 : i64} {
  func.func @_drop_path_rows_kernel(%arg0: i32, %arg1: i32, %arg2: memref<2xf32, #tpu.memory_space<smem>>, %arg3: memref<1x8x128xf32, #tpu.memory_space<vmem>>, %arg4: memref<1x8x128xf32, #tpu.memory_space<vmem>>) attributes {dimension_semantics = [#tpu.dimension_semantics<parallel>, #tpu.dimension_semantics<parallel>], iteration_bounds = array<i64: 2, 1>, scalar_prefetch = 0 : i64, scratch_operands = 0 : i64, tpu.core_type = #tpu.core_type<tc>, window_params = [{transform_indices = @transform_0, window_bounds = array<i64: 2>}, {transform_indices = @transform_1, window_bounds = array<i64: 1, 8, 128>}, {transform_indices = @transform_2, window_bounds = array<i64: 1, 8, 128>}]} {
    %c0 = arith.constant 0 : index
    %c0_0 = arith.constant 0 : index
    %c0_1 = arith.constant 0 : index
    %0 = vector.load %arg3[%c0, %c0_0, %c0_1] : memref<1x8x128xf32, #tpu.memory_space<vmem>>, vector<1x8x128xf32>
    %1 = arith.index_cast %arg0 : i32 to index
    %2 = memref.load %arg2[%1] : memref<2xf32, #tpu.memory_space<smem>>
    %3 = vector.broadcast %2 : f32 to vector<1x8x128xf32>
    %4 = arith.mulf %0, %3 : vector<1x8x128xf32>
    %c0_2 = arith.constant 0 : index
    %c0_3 = arith.constant 0 : index
    %c0_4 = arith.constant 0 : index
    %5 = vector.load %arg4[%c0_2, %c0_3, %c0_4] : memref<1x8x128xf32, #tpu.memory_space<vmem>>, vector<1x8x128xf32>
    tpu.vector_store %arg4[%c0_2, %c0_3, %c0_4], %4 {strides = array<i32>} : memref<1x8x128xf32, #tpu.memory_space<vmem>>, vector<1x8x128xf32>,
    return
  }
  func.func @transform_0(%arg0: i32, %arg1: i32) -> i32 {
    %c0_i32 = arith.constant 0 : i32
    %c0_i32_0 = arith.constant 0 : i32
    return %c0_i32 : i32
  }
  func.func @transform_1(%arg0: i32, %arg1: i32) -> (i32, i32, i32) {
    %c0_i32 = arith.constant 0 : i32
    %c0_i32_0 = arith.constant 0 : i32
    return %arg0, %arg1, %c0_i32 : i32, i32, i32
  }
  func.func @transform_2(%arg0: i32, %arg1: i32) -> (i32, i32, i32) {
    %c0_i32 = arith.constant 0 : i32
    %c0_i32_0 = arith.constant 0 : i32
    return %arg0, %arg1, %c0_i32 : i32, i32, i32
  }
}

</mosaic_0001>

<bundles_post_ra>
// kernel: tpu_custom_call.1
= control target key start
LH: loop header
LB: loop body
LE: loop exit
PB: predicated region body
PF: predicated region fallthrough
CT: control target
= control target key end

     0   :  { %7 = vsyncpa [#allocation5], 0  ;;  %s764_s0 = inlined_call_operand.hbm [shape: f32[2], index: 0, kind: input, shape index: {}]   ;;  %s765_s1 = inlined_call_operand.hbm [shape: f32[2,8,128], index: 1, kind: input, shape index: {}]   ;;  %s766_s2 = inlined_call_operand.hbm [shape: f32[2,8,128], index: 2, kind: output, shape index: {}]  }
   0x1   :  { %8 = vsyncpa [#allocation3], 0 }
   0x2   :  { %10 = vsyncpa [#allocation3 + $0x1], 0 }
   0x3   :  { %11 = vsyncpa [#allocation4], 0 }
   0x4   :  { %13 = vsyncpa [#allocation4 + $0x1], 0  ;;  %s537_s9 = smov 0   ;;  %s539_s10 = smov 0  }
   0x5   :  { %s541_s11 = smov 0   ;;  %s543_s12 = smov 0  }
   0x6   :  { %s545_s13 = smov 0   ;;  %s547_s14 = smov 0  }
   0x7 LB: > { %s300_s15 = sadd.s32 4294967295, %s517_s14   ;;  %s301_s16 = sadd.s32 4294967294, %s517_s14   ;;  %s517_s14 = sphi %s547_s14, %s19_s14   ;;  %s513_s13 = sphi %s545_s13, %s790_s13   ;;  %s509_s12 = sphi %s543_s12, %s789_s12   ;;  %s505_s11 = sphi %s541_s11, %s788_s11   ;;  %s501_s10 = sphi %s539_s10, %s787_s10   ;;  %s497_s9 = sphi %s537_s9, %s786_s9  }
   0x8   : > { %p74_p0 = scmp.ne.s32.totalorder %s501_s10, %s497_s9  ;;  %p571_p1 = scmp.eq.s32.totalorder %s300_s15, 0 }
   0x9   : > { %p575_p2 = scmp.eq.s32.totalorder %s300_s15, 1  ;;  %p106_p3 = scmp.eq.s32.totalorder %s301_s16, 1 }
   0xa   : > { %s771_s17 = scalar_select %p571_p1, 1, 0 }
   0xb   : > { %p581_p4 = por %p571_p1, %p74_p0  ;;  %p302_p5 = scmp.ge.s32.totalorder %s517_s14, 1 }
   0xc   : > { %p586_p6 = por %p106_p3, %p74_p0  ;;  %p113_p7 = scmp.lt.s32.totalorder %s517_s14, 3 }
   0xd   : > { %s773_s19 = scalar_select %p581_p4, 1, 0 }
   0xe   : > { %s774_s20 = scalar_select %p586_p6, 1, 0 }
   0xf   : > { %p591_p8 = pnand %p302_p5, %p113_p7  ;;  %s31_s22 = sadd.s32 1, %s513_s13 }
  0x10   : > { %p605_p12 = scmp.ge.s32.totalorder %s31_s22, 2  ;;  %s61_s25 = sadd.s32 1, %s505_s11 }
  0x11   : > { %p323_p10 = pneg %p591_p8  ;;  %p68_p13 = scmp.ne.s32.totalorder %s505_s11, %s501_s10 }
  0x12   : > { %p69_p0 = scmp.eq.s32.totalorder %s517_s14, 0  ;;  %s388_s28 = scalar_lea.hbm %s764_s0, 16 }
  0x13   : > { %p601_p11 = pnand %p323_p10, %p571_p1  ;;  %p389_p3 = scmp.ne.s32.totalorder %s764_s0, %s388_s28 }
  0x14   : > { %p395_p9 = scmp.lt.u32.totalorder %s388_s28, %s764_s0 }
  0x15   : > { %p390_p5 = pneg %p601_p11 }
  0x17   : > { %p391_p7 = pnand %p390_p5, %p389_p3 }
  0x19   : > { %p392_p10 = pneg %p391_p7 }
  0x1b   : > { %p397_p6 = pnand %p395_p9, %p392_p10 }
  0x1d   : > { %400 = shalt.err (!%p397_p6)
}
  0x1e   : > { %s519_s5 = smov [#allocation2]   ;;  %s792_s22 = smov (%p605_p12, %s31_s22), 0 }
  0x1f   : > { %326 = dma.hbm_to_smem (!%p601_p11), %s764_s0, 16, %s519_s5, [#allocation5]  }
  0x20   : > { %p636_p6 = por %p69_p0, %p68_p13  ;;  %p645_p9 = por %p575_p2, %p68_p13 }
  0x21   : > { %s56_s16 = ssub.s32 %s513_s13, %s792_s22  ;;  %p336_p3 = scmp.lt.s32.totalorder %s517_s14, 2 }
  0x22   : > { %s779_s15 = scalar_select %p645_p9, 1, 0 }
  0x23   : > { %p59_p5 = scmp.eq.s32.totalorder %s56_s16, 0  ;;  %s135_s23 = sand.u32 1, %s505_s11  }
  0x24   : > { %s305_s24 = sshll.u32 %s135_s23, 3  ;;  %s306_s27 = sshll.u32 %s513_s13, 7 }
  0x25   : > { %s654_s26 = scalar_select %p59_p5, %s505_s11, %s61_s25  }
  0x26   : > { %s660_s30 = scalar_lea.hbm %s765_s1, %s306_s27  ;;  %s139_s18 = scalar_lea.vmem [#allocation6], %s305_s24 }
  0x27   : > { %s147_s3 = sshll.u32 %s139_s18, 4  ;;  %p666_p2 = pnand %p336_p3, %p636_p6  ;;  %s662_s3 = int_to_ptr.vmem [resolvable:$true] %s147_s3 }
  0x28   : > { %s136_s25 = scalar_lea.sflag [#allocation3], %s135_s23  ;;  %s401_s5 = scalar_lea.hbm %s660_s30, 128 }
  0x29   : > { %p402_p11 = scmp.ne.s32.totalorder %s660_s30, %s401_s5  ;;  %p403_p12 = pneg %p666_p2 }
  0x2a   : > { %s406_s16 = scalar_lea.hbm %s765_s1, 256  ;;  %p407_p7 = scmp.lt.u32.totalorder %s660_s30, %s765_s1 }
  0x2b   : > { %p404_p13 = pnand %p403_p12, %p402_p11  ;;  %p408_p10 = scmp.lt.u32.totalorder %s406_s16, %s401_s5 }
  0x2c   : > { %p410_p3 = scmp.lt.u32.totalorder %s401_s5, %s660_s30 }
  0x2d   : > { %p405_p0 = pneg %p404_p13  ;;  %p409_p6 = por %p408_p10, %p407_p7 }
  0x2f   : > { %p411_p5 = por %p410_p3, %p409_p6 }
  0x31   : > { %p412_p9 = pnand %p411_p5, %p405_p0 }
  0x33   : > { %415 = shalt.err (!%p412_p9)
}
  0x34   : > { %s416_s23 = scalar_lea.vmem %s662_s3, 128  ;;  %s520_s27 = smov [#allocation6]  }
  0x35   : > { %p417_p11 = scmp.ne.s32.totalorder %s662_s3, %s416_s23  ;;  %s421_s28 = sshll.u32 %s520_s27, 4  ;;  %s422_s28 = int_to_ptr.vmem [resolvable:$false] %s421_s28 }
  0x36   : > { %s423_s29 = scalar_lea.vmem %s422_s28, 256  ;;  %p424_p1 = scmp.lt.s32.totalorder %s662_s3, %s422_s28 }
  0x37   : > { %p419_p13 = pnand %p417_p11, %p403_p12  ;;  %p425_p7 = scmp.lt.s32.totalorder %s423_s29, %s416_s23 }
  0x39   : > { %p420_p4 = pneg %p419_p13  ;;  %p426_p10 = por %p425_p7, %p424_p1 }
  0x3b   : > { %p427_p6 = pnand %p426_p10, %p420_p4 }
  0x3d   : > { %430 = shalt.err (!%p427_p6)
}
  0x3e   : > { %330 = dma.hbm_to_vmem [thread:$0]  (!%p666_p2), %s660_s30, 128, %s662_s3, %s136_s25  }
  0x3f   : > { %156 = sbr.rel (%p591_p8) target bundleno = 103 (0x67), region = 28  ;;  %p781_p9 = scmp.ne.s32.totalorder (!%p591_p8), %s771_s17, 0 }
  0x46   : > { %484 = dma.done.wait (%p781_p9), [#allocation5], 16  }
  0x47   : > { %486 = vsyncadd (%p781_p9), [#allocation5], 4294967280  ;;  %s702_s18 = sand.u32 1, %s501_s10   ;;  %p782_p1 = scmp.ne.s32.totalorder %s773_s19, 0 }
  0x48   : > { %s309_s5 = sshll.u32 %s702_s18, 3  ;;  %s163_s4 = scalar_lea.sflag [#allocation3], %s702_s18 }
  0x49   : > { %s166_s6 = scalar_lea.vmem [#allocation6], %s309_s5 }
  0x4a   : > { %488 = dma.done.wait (%p782_p1), %s163_s4, 128  }
  0x4b   : > { %490 = vsyncadd (%p782_p1), %s163_s4, 4294967168 }
  0x4c   : > { %171 = sfence }
  0x4d   : > { %s189_s17 = sld [smem:[#allocation2 + %s509_s12]]  ;;  %v188_v0 = vld [vmem:[%s166_s6] sm:$0xff]  ;;  %s187_s21 = scalar_lea.vmem [#allocation7], %s309_s5 }
  0x4e   : > { %s208_s30 = sshll.u32 %s187_s21, 4  ;;  %s312_s3 = sshll.u32 %s509_s12, 7  ;;  %s712_s30 = int_to_ptr.vmem [resolvable:$true] %s208_s30 }
  0x4f   : > { %s717_s19 = scalar_lea.hbm %s766_s2, %s312_s3  ;;  %s194_s16 = scalar_lea.sflag [#allocation4], %s702_s18 }
  0x50   : > { %s431_s8 = scalar_lea.vmem %s712_s30, 128  ;;  %p783_p8 = scmp.ne.s32.totalorder %s779_s15, 0 }
  0x51   : > { %p432_p4 = scmp.ne.s32.totalorder %s712_s30, %s431_s8  ;;  %s521_s12 = smov [#allocation7]  }
  0x52   : > { %s435_s24 = sshll.u32 %s521_s12, 4  ;;  %s436_s24 = int_to_ptr.vmem [resolvable:$false] %s435_s24 }
  0x53   : > { %v190_v1 = vstv %s189_s17  ;;  %p433_p2 = pnand %p432_p4, %p783_p8  ;;  %s437_s23 = scalar_lea.vmem %s436_s24, 256 }
  0x54   : > { %v191_v2 = vmul.f32 %v190_v1, %v188_v0  ;;  %p438_p0 = scmp.lt.s32.totalorder %s712_s30, %s436_s24  ;;  %p439_p3 = scmp.lt.s32.totalorder %s437_s23, %s431_s8 }
  0x55   : > { %p434_p12 = pneg %p433_p2 }
  0x56   : > { %192 = vst [vmem:[%s187_s21] sm:$0xff] %v191_v2  ;;  %p440_p5 = por %p439_p3, %p438_p0 }
  0x58   : > { %p441_p11 = pnand %p440_p5, %p434_p12 }
  0x5a   : > { %444 = shalt.err (!%p441_p11)
}
  0x5b   : > { %s445_s27 = scalar_lea.hbm %s717_s19, 128  ;;  %s449_s18 = scalar_lea.hbm %s766_s2, 256 }
  0x5c   : > { %p446_p13 = scmp.ne.s32.totalorder %s717_s19, %s445_s27  ;;  %p450_p6 = scmp.lt.u32.totalorder %s717_s19, %s766_s2 }
  0x5d   : > { %p451_p9 = scmp.lt.u32.totalorder %s449_s18, %s445_s27  ;;  %p453_p4 = scmp.lt.u32.totalorder %s445_s27, %s717_s19 }
  0x5e   : > { %p447_p7 = pnand %p446_p13, %p783_p8 }
  0x5f   : > { %p452_p1 = por %p451_p9, %p450_p6 }
  0x60   : > { %p448_p10 = pneg %p447_p7 }
  0x61   : > { %p454_p2 = por %p453_p4, %p452_p1 }
  0x63   : > { %p455_p12 = pnand %p454_p2, %p448_p10 }
  0x65   : > { %458 = shalt.err (!%p455_p12)
}
  0x66   : > { %321 = dma.vmem_to_hbm [thread:$0]  (%p783_p8), %s712_s30, 128, %s717_s19, %s194_s16  }
  0x67 PF: > { %s220_s6 = sand.u32 1, %s497_s9   ;;  %p784_p0 = scmp.ne.s32.totalorder %s774_s20, 0 }
  0x68   : > { %p785_p3 = scmp.ge.s32.totalorder %s517_s14, 2  ;;  %s221_s17 = scalar_lea.sflag [#allocation4], %s220_s6 }
  0x6a   : > { %p332_p5 = pnand %p785_p3, %p784_p0 }
  0x6c   : > { %492 = dma.done.wait (!%p332_p5), %s221_s17, 128  }
  0x6d   : > { %494 = vsyncadd (!%p332_p5), %s221_s17, 4294967168  ;;  %s19_s14 = sadd.s32 1, %s517_s14   ;;  %s786_s9 = smov %s501_s10 }
  0x6e   : > { %p16_p11 = scmp.ge.s32.totalorder %s19_s14, 4   ;;  %s787_s10 = smov %s505_s11 }
  0x6f   : > { %s788_s11 = smov %s654_s26  ;;  %s789_s12 = smov %s513_s13 }
  0x70   : > { %s790_s13 = smov %s792_s22  ;;  %18 = sbr.rel (!%p16_p11) target bundleno = 7 (0x7), region = 78 }
  0x77   :  { %226 = vsyncpa [#allocation3], 1 }
  0x78   :  { %228 = vsyncpa [#allocation3 + $0x1], 1 }
  0x79   :  { %229 = vsyncpa [#allocation4], 1 }
  0x7a   :  { %231 = vsyncpa [#allocation4 + $0x1], 1 }
  0x7b   :  { %232 = vsyncpa [#allocation5], 1 }
  0x7c   :  { %234 = vsyncpa [#allocation5 + $0x1], 1 }

</bundles_post_ra>
